<compile_context>
chip_gen: v7x
topology: tpu7x:2x2x1
jax: 0.10.0
libtpu: 0.0.40
codegen_flags: <defaults>
</compile_context>

<pallas_src>
import functools
import math

import jax
import jax.numpy as jnp
from jax import lax
from jax.experimental import pallas as pl
from jax.experimental.pallas import tpu as pltpu

LOG_SQRT_2PI = 0.5 * math.log(2.0 * math.pi)
_SEED_MIX = 0x27D4EB2F  # large odd 32-bit constant for per-tile seed diffusion


# ---------------------------------------------------------------------------
# Probe: can we sample standard normals with the on-core PRNG on this backend?
# ---------------------------------------------------------------------------
def _probe_in_kernel_rng():
    if not (hasattr(pltpu, "prng_seed") and hasattr(pltpu, "stateful_normal")):
        return False

    def _k(seed_ref, o_ref):
        pltpu.prng_seed(seed_ref[0])
        o_ref[...] = pltpu.stateful_normal((8, 128), jnp.float32)

    try:
        out = pl.pallas_call(
            _k,
            out_shape=jax.ShapeDtypeStruct((8, 128), jnp.float32),
            in_specs=[pl.BlockSpec(memory_space=pltpu.MemorySpace.SMEM)],
            out_specs=pl.BlockSpec(memory_space=pltpu.MemorySpace.VMEM),
        )(jnp.array([42], jnp.int32))
        out = jax.block_until_ready(out)
        return bool(jnp.all(jnp.isfinite(out)))
    except Exception:
        return False


_IN_KERNEL_RNG = _probe_in_kernel_rng()


# ---------------------------------------------------------------------------
# Fused kernel: reparameterized sample + tiled bf16 matmul + log-prob partials
# ---------------------------------------------------------------------------
def _bayes_linear_kernel(*refs, sample, fuse_logs, in_kernel_rng):
    it = iter(refs)
    seed_ref = next(it)                                   # scalar prefetch, (1,) int32
    x_ref = next(it)                                      # (tm, tk)
    wmu_ref = next(it)                                    # (tn, tk)
    wsig_ref = next(it) if sample else None               # (tn, tk) f32 (softplus(rho))
    weps_ref = next(it) if (sample and not in_kernel_rng) else None
    bmu_ref = next(it)                                    # (1, tn)
    bsig_ref = next(it) if sample else None               # (1, tn) f32
    beps_ref = next(it) if sample else None               # (1, tn) f32
    out_ref = next(it)                                    # (tm, tn)
    logp_ref = next(it) if fuse_logs else None            # (1,1,1,1) f32 partial
    logq_ref = next(it) if fuse_logs else None            # (1,1,1,1) f32 partial
    acc_ref = next(it)                                    # VMEM scratch (tm, tn) f32

    i = pl.program_id(0)   # batch tile
    j = pl.program_id(1)   # output tile
    k = pl.program_id(2)   # reduction tile (innermost)
    nk = pl.num_programs(2)

    # --- weight tile for this (j, k): sample is deterministic w.r.t. batch tile i ---
    if sample:
        w_sigma = wsig_ref[...].astype(jnp.float32)
        if in_kernel_rng:
            # Seed depends only on (j, k) so every batch tile / core draws the same
            # sample; mixed with a large odd constant for diffusion.
            tile_id = j * nk + k
            pltpu.prng_seed(seed_ref[0] + (tile_id + 1) * jnp.int32(_SEED_MIX))
            w_eps = pltpu.stateful_normal(w_sigma.shape, jnp.float32)
        else:
            w_eps = weps_ref[...].astype(jnp.float32)
        w_f32 = wmu_ref[...].astype(jnp.float32) + w_sigma * w_eps
        w_mxu = w_f32.astype(jnp.bfloat16)                 # native MXU path
    else:
        w_mxu = wmu_ref[...].astype(jnp.bfloat16)

    # --- matmul accumulation in f32 scratch; MXU consumes bf16 operands ---
    @pl.when(k == 0)
    def _init_acc():
        acc_ref[...] = jnp.zeros_like(acc_ref)

    acc_ref[...] += lax.dot_general(
        x_ref[...].astype(jnp.bfloat16), w_mxu,
        dimension_numbers=(((1,), (1,)), ((), ())),   # contract In vs In, no transpose
        preferred_element_type=jnp.float32)

    # --- finalize: sample/add the bias exactly once, on the last reduction step ---
    @pl.when(k == nk - 1)
    def _store_out():
        b = bmu_ref[...].astype(jnp.float32)
        if sample:
            b = b + bsig_ref[...].astype(jnp.float32) * beps_ref[...].astype(jnp.float32)
        out_ref[...] = (acc_ref[...] + b).astype(out_ref.dtype)

    # --- fused log-prior / log-posterior partial sums (sample mode only) ---
    if fuse_logs:
        @pl.when(k == 0)
        def _zero_logs():
            logp_ref[...] = jnp.zeros_like(logp_ref)
            logq_ref[...] = jnp.zeros_like(logq_ref)

        # Weight terms: count each (j, k) tile exactly once (only the i == 0 sweep).
        @pl.when(i == 0)
        def _acc_w_logs():
            # Prior: standard Normal N(0, 1).
            logp_ref[...] += jnp.sum(
                -LOG_SQRT_2PI - 0.5 * w_f32 * w_f32,
                keepdims=True).reshape(1, 1, 1, 1)
            # (w - mu) / sigma == eps  ->  no subtraction / division needed.
            logq_ref[...] += jnp.sum(
                -LOG_SQRT_2PI - jnp.log(w_sigma) - 0.5 * w_eps * w_eps,
                keepdims=True).reshape(1, 1, 1, 1)

        # Bias terms: count each j tile exactly once.
        @pl.when((i == 0) & (k == 0))
        def _acc_b_logs():
            b_sigma = bsig_ref[...].astype(jnp.float32)
            b_eps = beps_ref[...].astype(jnp.float32)
            b_s = bmu_ref[...].astype(jnp.float32) + b_sigma * b_eps
            logp_ref[...] += jnp.sum(
                -LOG_SQRT_2PI - 0.5 * b_s * b_s,
                keepdims=True).reshape(1, 1, 1, 1)
            logq_ref[...] += jnp.sum(
                -LOG_SQRT_2PI - jnp.log(b_sigma) - 0.5 * b_eps * b_eps,
                keepdims=True).reshape(1, 1, 1, 1)


# ---------------------------------------------------------------------------
# Wrapper
# ---------------------------------------------------------------------------
def _pick_tile(dim, target, align):
    """Largest tile <= target that divides `dim` and respects TPU alignment."""
    if dim <= target:
        return dim
    t = (target // align) * align
    while t >= align:
        if dim % t == 0:
            return t
        t -= align
    return dim


def bayesian_linear_forward(x, params, key, *, is_training, is_sampling=False,
                            is_calc_log_proba=False,
                            tile_m=512, tile_n=512, tile_k=512):
    """Returns (out, log_prior, log_post) mirroring BayesianLinear.forward."""
    w_mu, w_rho, b_mu, b_rho = params
    out_f, in_f = w_mu.shape
    batch = x.shape[0]
    dtype = x.dtype

    sample = bool(is_training) or bool(is_sampling)
    logprob = bool(is_training) or bool(is_calc_log_proba)
    fuse_logs = sample and logprob   # logs need the (never-materialized) sampled w

    # batch/out tiles need sublane (8) alignment when splitting; lane dims need 128.
    tm = _pick_tile(batch, tile_m, 8)
    tn = _pick_tile(out_f, tile_n, 128)
    tk = _pick_tile(in_f, tile_k, 128)
    ni, nj, nk = batch // tm, out_f // tn, in_f // tk

    b_mu2d = b_mu.reshape(1, out_f)

    if sample:
        k_seed, k_weps, k_beps = jax.random.split(key, 3)
        seed = jax.random.randint(k_seed, (1,), 0, jnp.iinfo(jnp.int32).max,
                                  dtype=jnp.int32)
        # Precompute sigma = softplus(rho) in XLA: same HBM bytes into the kernel,
        # two fewer EUP ops per element per grid step.
        w_sigma = jax.nn.softplus(w_rho.astype(jnp.float32))
        b_sigma2d = jax.nn.softplus(b_rho.astype(jnp.float32)).reshape(1, out_f)
        b_eps2d = jax.random.normal(k_beps, (1, out_f), jnp.float32)
    else:
        seed = jnp.zeros((1,), jnp.int32)

    x_spec = pl.BlockSpec((tm, tk), lambda i, j, k, s: (i, k))
    w_spec = pl.BlockSpec((tn, tk), lambda i, j, k, s: (j, k))
    b_spec = pl.BlockSpec((1, tn), lambda i, j, k, s: (0, j))

    operands, in_specs = [x, w_mu], [x_spec, w_spec]
    if sample:
        operands.append(w_sigma)
        in_specs.append(w_spec)
        if not _IN_KERNEL_RNG:
            # Fallback: materialize the weight eps host-side (one extra HBM stream).
            operands.append(jax.random.normal(k_weps, (out_f, in_f), jnp.float32))
            in_specs.append(w_spec)
    operands.append(b_mu2d)
    in_specs.append(b_spec)
    if sample:
        operands += [b_sigma2d, b_eps2d]
        in_specs += [b_spec, b_spec]

    out_spec = pl.BlockSpec((tm, tn), lambda i, j, k, s: (i, j))
    if fuse_logs:
        # Per-(i,j) partials: each (1,1,1,1) block is written during one contiguous
        # k-sweep, so both i and j stay megacore-"parallel"; summed in JAX below.
        part_spec = pl.BlockSpec((1, 1, 1, 1), lambda i, j, k, s: (i, j, 0, 0))
        out_shape = (jax.ShapeDtypeStruct((batch, out_f), dtype),
                     jax.ShapeDtypeStruct((ni, nj, 1, 1), jnp.float32),
                     jax.ShapeDtypeStruct((ni, nj, 1, 1), jnp.float32))
        out_specs = (out_spec, part_spec, part_spec)
    else:
        out_shape = jax.ShapeDtypeStruct((batch, out_f), dtype)
        out_specs = out_spec

    # Right-size the VMEM limit: double-buffered input/output tiles + acc scratch,
    # plus ~50% headroom for compiler-internal scratch. Clamped to [16, 100] MiB.
    in_bytes = tm * tk * jnp.dtype(x.dtype).itemsize \
        + tn * tk * jnp.dtype(w_mu.dtype).itemsize
    if sample:
        in_bytes += tn * tk * 4                              # sigma
        if not _IN_KERNEL_RNG:
            in_bytes += tn * tk * 4                          # eps fallback
        in_bytes += 3 * tn * 4                               # bias rows
    else:
        in_bytes += tn * jnp.dtype(b_mu.dtype).itemsize
    out_bytes = tm * tn * jnp.dtype(dtype).itemsize + (8 if fuse_logs else 0)
    scratch_bytes = tm * tn * 4
    vmem_limit = 2 * (in_bytes + out_bytes) * 3 // 2 + scratch_bytes + (2 << 20)
    vmem_limit = int(min(max(vmem_limit, 16 << 20), 100 << 20))

    kernel = functools.partial(_bayes_linear_kernel, sample=sample,
                               fuse_logs=fuse_logs, in_kernel_rng=_IN_KERNEL_RNG)

    result = pl.pallas_call(
        kernel,
        out_shape=out_shape,
        grid_spec=pltpu.PrefetchScalarGridSpec(
            num_scalar_prefetch=1,
            grid=(ni, nj, nk),
            in_specs=in_specs,
            out_specs=out_specs,
            scratch_shapes=[pltpu.VMEM((tm, tn), jnp.float32)],
        ),
        compiler_params=pltpu.CompilerParams(
            dimension_semantics=("parallel", "parallel", "arbitrary"),
            vmem_limit_bytes=vmem_limit,
        ),
    )(seed, *operands)

    if fuse_logs:
        out, lp_parts, lq_parts = result
        return out, jnp.sum(lp_parts), jnp.sum(lq_parts)
    if logprob:
        # eval + isCalcLogProba: weights are deterministic (mu); the log terms are a
        # one-pass, memory-bound XLA reduction — rho/sigma never enters the matmul
        # kernel, halving its weight-stream HBM traffic.
        w_sig = jax.nn.softplus(w_rho.astype(jnp.float32))
        b_sig = jax.nn.softplus(b_rho.astype(jnp.float32))
        lp = (jnp.sum(-LOG_SQRT_2PI - 0.5 * w_mu.astype(jnp.float32) ** 2)
              + jnp.sum(-LOG_SQRT_2PI - 0.5 * b_mu.astype(jnp.float32) ** 2))
        lq = (jnp.sum(-LOG_SQRT_2PI - jnp.log(w_sig))
              + jnp.sum(-LOG_SQRT_2PI - jnp.log(b_sig)))
        return result, lp, lq
    return result, jnp.float32(0.0), jnp.float32(0.0)


def init_params(key, in_features, out_features,
                post_mu_init=(-0.2, 0.2), post_rho_init=(-5.0, -4.0),
                dtype=jnp.float32):
    k1, k2, k3, k4 = jax.random.split(key, 4)
    w_mu = jax.random.uniform(k1, (out_features, in_features), dtype,
                              post_mu_init[0], post_mu_init[1])
    w_rho = jax.random.uniform(k2, (out_features, in_features), dtype,
                               post_rho_init[0], post_rho_init[1])
    b_mu = jax.random.uniform(k3, (out_features,), dtype,
                              post_mu_init[0], post_mu_init[1])
    b_rho = jax.random.uniform(k4, (out_features,), dtype,
                               post_rho_init[0], post_rho_init[1])
    return w_mu, w_rho, b_mu, b_rho


def _ref_linear_bf16(x, w, b):
    """Reference linear with the same bf16 rounding of MXU operands, f32 accumulate."""
    xb = x.astype(jnp.bfloat16).astype(jnp.float32)
    wb = w.astype(jnp.bfloat16).astype(jnp.float32)
    return xb @ wb.T + b.astype(jnp.float32)


if __name__ == "__main__":
    key = jax.random.PRNGKey(0)
    k_param, k_data, k_noise, k_param2, k_data2, k_noise2 = jax.random.split(key, 6)

    # -------- small config: single-tile grid (1, 1, 1) --------
    in_f, out_f, batch = 32, 16, 8
    params = init_params(k_param, in_f, out_f)
    w_mu, w_rho, b_mu, b_rho = params
    x = jax.random.normal(k_data, (batch, in_f), jnp.float32)

    # training mode: sampled weights + fused log_prior / log_post
    out_train, lp_t, lq_t = bayesian_linear_forward(x, params, k_noise,
                                                    is_training=True)
    assert out_train.shape == (batch, out_f)
    assert bool(jnp.all(jnp.isfinite(out_train)))
    assert bool(jnp.isfinite(lp_t)) and bool(jnp.isfinite(lq_t))

    # sampling-only mode: sampled weights, no log terms
    out_samp, lp_s0, lq_s0 = bayesian_linear_forward(x, params, k_noise,
                                                     is_training=False,
                                                     is_sampling=True)
    assert bool(jnp.all(jnp.isfinite(out_samp)))
    assert float(lp_s0) == 0.0 and float(lq_s0) == 0.0

    # eval mode: mean weights, no log terms, no sigma/eps DMA
    out_eval, lp0, lq0 = bayesian_linear_forward(x, params, k_noise,
                                                 is_training=False)
    ref_eval = _ref_linear_bf16(x, w_mu, b_mu)
    assert jnp.allclose(out_eval, ref_eval, atol=1e-2, rtol=1e-2)
    assert float(lp0) == 0.0 and float(lq0) == 0.0

    # calc-log-proba mode (deterministic): matmul kernel + XLA log reductions
    out_clp, lp_c, lq_c = bayesian_linear_forward(
        x, params, k_noise, is_training=False, is_calc_log_proba=True)
    w_sig, b_sig = jax.nn.softplus(w_rho), jax.nn.softplus(b_rho)
    ref_lp = (jnp.sum(-LOG_SQRT_2PI - 0.5 * w_mu ** 2)
              + jnp.sum(-LOG_SQRT_2PI - 0.5 * b_mu ** 2))
    ref_lq = (jnp.sum(-LOG_SQRT_2PI - jnp.log(w_sig))
              + jnp.sum(-LOG_SQRT_2PI - jnp.log(b_sig)))
    assert jnp.allclose(out_clp, ref_eval, atol=1e-2, rtol=1e-2)
    assert jnp.allclose(lp_c, ref_lp, rtol=1e-4, atol=1e-2)
    assert jnp.allclose(lq_c, ref_lq, rtol=1e-4, atol=1e-2)

    # -------- multi-tile config: grid (2, 2, 2) with small tile overrides --------
    in2, out2, batch2 = 256, 256, 16
    params2 = init_params(k_param2, in2, out2)
    w_mu2, w_rho2, b_mu2, b_rho2 = params2
    x_half = jax.random.normal(k_data2, (batch2 // 2, in2), jnp.float32)
    x2 = jnp.concatenate([x_half, x_half], axis=0)   # duplicated rows across tiles
    tiles = dict(tile_m=8, tile_n=128, tile_k=128)

    out2_c, lp2, lq2 = bayesian_linear_forward(
        x2, params2, k_noise2, is_training=False, is_calc_log_proba=True, **tiles)
    ref2 = _ref_linear_bf16(x2, w_mu2, b_mu2)
    w_sig2 = jax.nn.softplus(w_rho2.astype(jnp.float32))
    b_sig2 = jax.nn.softplus(b_rho2.astype(jnp.float32))
    ref_lp2 = (jnp.sum(-LOG_SQRT_2PI - 0.5 * w_mu2 ** 2)
               + jnp.sum(-LOG_SQRT_2PI - 0.5 * b_mu2 ** 2))
    ref_lq2 = (jnp.sum(-LOG_SQRT_2PI - jnp.log(w_sig2))
               + jnp.sum(-LOG_SQRT_2PI - jnp.log(b_sig2)))
    assert jnp.allclose(out2_c, ref2, atol=2e-2, rtol=2e-2)
    assert jnp.allclose(lp2, ref_lp2, rtol=1e-4, atol=1e-1)
    assert jnp.allclose(lq2, ref_lq2, rtol=1e-4, atol=1e-1)

    # training on the multi-tile grid: rows 0:8 and 8:16 of x2 are identical, so with
    # a batch-consistent weight sample the two batch tiles must match exactly.
    out2_t, lp2_t, lq2_t = bayesian_linear_forward(
        x2, params2, k_noise2, is_training=True, **tiles)
    assert jnp.allclose(out2_t[:batch2 // 2], out2_t[batch2 // 2:],
                        atol=1e-5, rtol=1e-5)
    assert bool(jnp.all(jnp.isfinite(out2_t)))
    assert bool(jnp.isfinite(lp2_t)) and bool(jnp.isfinite(lq2_t))

    # -------- fused log-path validation via the host-eps fallback --------
    _saved_rng_flag = _IN_KERNEL_RNG
    _IN_KERNEL_RNG = False
    out_fb, lp_fb, lq_fb = bayesian_linear_forward(
        x2, params2, k_noise2, is_training=True, **tiles)
    _k_seed_r, k_weps_r, k_beps_r = jax.random.split(k_noise2, 3)
    w_eps_r = jax.random.normal(k_weps_r, (out2, in2), jnp.float32)
    b_eps_r = jax.random.normal(k_beps_r, (1, out2), jnp.float32)
    w_s = w_mu2.astype(jnp.float32) + w_sig2 * w_eps_r
    b_s = b_mu2.astype(jnp.float32) + b_sig2 * b_eps_r[0]
    ref_out_s = _ref_linear_bf16(x2, w_s, b_s)
    ref_lp_s = (jnp.sum(-LOG_SQRT_2PI - 0.5 * w_s ** 2)
                + jnp.sum(-LOG_SQRT_2PI - 0.5 * b_s ** 2))
    ref_lq_s = (jnp.sum(-LOG_SQRT_2PI - jnp.log(w_sig2) - 0.5 * w_eps_r ** 2)
                + jnp.sum(-LOG_SQRT_2PI - jnp.log(b_sig2) - 0.5 * b_eps_r ** 2))
    assert jnp.allclose(out_fb, ref_out_s, atol=2e-2, rtol=2e-2)
    assert jnp.allclose(lp_fb, ref_lp_s, rtol=5e-4, atol=5.0)
    assert jnp.allclose(lq_fb, ref_lq_s, rtol=5e-4, atol=5.0)
    _IN_KERNEL_RNG = _saved_rng_flag

    jax.block_until_ready((out_train, lp_t, lq_t, out_samp, out_eval, out_clp,
                           out2_c, lp2, lq2, out2_t, out_fb, lp_fb, lq_fb))
    print("KERNEL_OK")
</pallas_src>

<mosaic_0001>
module attributes {stable_mosaic.version = 11 : i64} {
  func.func @_k(%arg0: memref<1xi32, #tpu.memory_space<smem>>, %arg1: memref<8x128xf32, #tpu.memory_space<vmem>>) attributes {dimension_semantics = [], scalar_prefetch = 0 : i64, scratch_operands = 0 : i64, tpu.core_type = #tpu.core_type<tc>} {
    %c0 = arith.constant 0 : index
    %0 = memref.load %arg0[%c0] : memref<1xi32, #tpu.memory_space<smem>>
    "tpu.prng_set_seed_32"(%0) : (i32) -> ()
    %c0_i32 = arith.constant 0 : i32
    %c0_i32_0 = arith.constant 0 : i32
    %cst = arith.constant -0.99999994 : f32
    %cst_1 = arith.constant 1.000000e+00 : f32
    %1 = vector.broadcast %cst : f32 to vector<1x1xf32>
    %2 = vector.broadcast %cst_1 : f32 to vector<1x1xf32>
    %3 = "tpu.prng_random_bits"() : () -> vector<8x128xi32>
    %c9_i32 = arith.constant 9 : i32
    %4 = vector.broadcast %c9_i32 : i32 to vector<8x128xi32>
    %5 = arith.shrui %3, %4 : vector<8x128xi32>
    %c1065353216_i32 = arith.constant 1065353216 : i32
    %6 = vector.broadcast %c1065353216_i32 : i32 to vector<8x128xi32>
    %7 = arith.ori %5, %6 : vector<8x128xi32>
    %8 = tpu.bitcast %7 : vector<8x128xi32> -> vector<8x128xf32>
    %cst_2 = arith.constant 1.000000e+00 : f32
    %9 = vector.broadcast %cst_2 : f32 to vector<8x128xf32>
    %10 = arith.subf %8, %9 : vector<8x128xf32>
    %11 = arith.subf %2, %1 : vector<1x1xf32>
    %12 = vector.broadcast %11 : vector<1x1xf32> to vector<8x128xf32>
    %13 = arith.mulf %10, %12 : vector<8x128xf32>
    %14 = vector.broadcast %1 : vector<1x1xf32> to vector<8x128xf32>
    %15 = arith.addf %13, %14 : vector<8x128xf32>
    %16 = vector.broadcast %1 : vector<1x1xf32> to vector<8x128xf32>
    %17 = arith.maximumf %16, %15 : vector<8x128xf32>
    %cst_3 = arith.constant 0.000000e+00 : f32
    %18 = vector.broadcast %cst_3 : f32 to vector<8x128xf32>
    %19 = arith.subf %18, %17 : vector<8x128xf32>
    %20 = arith.mulf %17, %19 : vector<8x128xf32>
    %21 = math.log1p %20 : vector<8x128xf32>
    %cst_4 = arith.constant 0.000000e+00 : f32
    %22 = vector.broadcast %cst_4 : f32 to vector<8x128xf32>
    %23 = arith.subf %22, %21 : vector<8x128xf32>
    %cst_5 = arith.constant 5.000000e+00 : f32
    %24 = vector.broadcast %cst_5 : f32 to vector<8x128xf32>
    %25 = arith.cmpf olt, %23, %24 : vector<8x128xf32>
    %cst_6 = arith.constant 2.500000e+00 : f32
    %26 = vector.broadcast %cst_6 : f32 to vector<8x128xf32>
    %27 = arith.subf %23, %26 : vector<8x128xf32>
    %28 = math.sqrt %23 : vector<8x128xf32>
    %cst_7 = arith.constant 3.000000e+00 : f32
    %29 = vector.broadcast %cst_7 : f32 to vector<8x128xf32>
    %30 = arith.subf %28, %29 : vector<8x128xf32>
    %31 = arith.select %25, %27, %30 : vector<8x128xi1>, vector<8x128xf32>
    %cst_8 = arith.constant 2.81022636E-8 : f32
    %cst_9 = arith.constant -2.00214257E-4 : f32
    %32 = vector.broadcast %cst_8 : f32 to vector<8x128xf32>
    %33 = vector.broadcast %cst_9 : f32 to vector<8x128xf32>
    %34 = arith.select %25, %32, %33 : vector<8x128xi1>, vector<8x128xf32>
    %cst_10 = arith.constant 3.43273939E-7 : f32
    %cst_11 = arith.constant 1.00950558E-4 : f32
    %35 = vector.broadcast %cst_10 : f32 to vector<8x128xf32>
    %36 = vector.broadcast %cst_11 : f32 to vector<8x128xf32>
    %37 = arith.select %25, %35, %36 : vector<8x128xi1>, vector<8x128xf32>
    %38 = arith.mulf %34, %31 : vector<8x128xf32>
    %39 = arith.addf %37, %38 : vector<8x128xf32>
    %cst_12 = arith.constant -3.5233877E-6 : f32
    %cst_13 = arith.constant 0.00134934322 : f32
    %40 = vector.broadcast %cst_12 : f32 to vector<8x128xf32>
    %41 = vector.broadcast %cst_13 : f32 to vector<8x128xf32>
    %42 = arith.select %25, %40, %41 : vector<8x128xi1>, vector<8x128xf32>
    %43 = arith.mulf %39, %31 : vector<8x128xf32>
    %44 = arith.addf %42, %43 : vector<8x128xf32>
    %cst_14 = arith.constant -4.39150654E-6 : f32
    %cst_15 = arith.constant -0.00367342844 : f32
    %45 = vector.broadcast %cst_14 : f32 to vector<8x128xf32>
    %46 = vector.broadcast %cst_15 : f32 to vector<8x128xf32>
    %47 = arith.select %25, %45, %46 : vector<8x128xi1>, vector<8x128xf32>
    %48 = arith.mulf %44, %31 : vector<8x128xf32>
    %49 = arith.addf %47, %48 : vector<8x128xf32>
    %cst_16 = arith.constant 2.1858087E-4 : f32
    %cst_17 = arith.constant 0.00573950773 : f32
    %50 = vector.broadcast %cst_16 : f32 to vector<8x128xf32>
    %51 = vector.broadcast %cst_17 : f32 to vector<8x128xf32>
    %52 = arith.select %25, %50, %51 : vector<8x128xi1>, vector<8x128xf32>
    %53 = arith.mulf %49, %31 : vector<8x128xf32>
    %54 = arith.addf %52, %53 : vector<8x128xf32>
    %cst_18 = arith.constant -0.00125372503 : f32
    %cst_19 = arith.constant -0.0076224613 : f32
    %55 = vector.broadcast %cst_18 : f32 to vector<8x128xf32>
    %56 = vector.broadcast %cst_19 : f32 to vector<8x128xf32>
    %57 = arith.select %25, %55, %56 : vector<8x128xi1>, vector<8x128xf32>
    %58 = arith.mulf %54, %31 : vector<8x128xf32>
    %59 = arith.addf %57, %58 : vector<8x128xf32>
    %cst_20 = arith.constant -0.00417768164 : f32
    %cst_21 = arith.constant 0.00943887047 : f32
    %60 = vector.broadcast %cst_20 : f32 to vector<8x128xf32>
    %61 = vector.broadcast %cst_21 : f32 to vector<8x128xf32>
    %62 = arith.select %25, %60, %61 : vector<8x128xi1>, vector<8x128xf32>
    %63 = arith.mulf %59, %31 : vector<8x128xf32>
    %64 = arith.addf %62, %63 : vector<8x128xf32>
    %cst_22 = arith.constant 0.246640727 : f32
    %cst_23 = arith.constant 1.00167406 : f32
    %65 = vector.broadcast %cst_22 : f32 to vector<8x128xf32>
    %66 = vector.broadcast %cst_23 : f32 to vector<8x128xf32>
    %67 = arith.select %25, %65, %66 : vector<8x128xi1>, vector<8x128xf32>
    %68 = arith.mulf %64, %31 : vector<8x128xf32>
    %69 = arith.addf %67, %68 : vector<8x128xf32>
    %cst_24 = arith.constant 1.50140941 : f32
    %cst_25 = arith.constant 2.83297682 : f32
    %70 = vector.broadcast %cst_24 : f32 to vector<8x128xf32>
    %71 = vector.broadcast %cst_25 : f32 to vector<8x128xf32>
    %72 = arith.select %25, %70, %71 : vector<8x128xi1>, vector<8x128xf32>
    %73 = arith.mulf %69, %31 : vector<8x128xf32>
    %74 = arith.addf %72, %73 : vector<8x128xf32>
    %75 = math.absf %17 : vector<8x128xf32>
    %cst_26 = arith.constant 1.000000e+00 : f32
    %76 = vector.broadcast %cst_26 : f32 to vector<8x128xf32>
    %77 = arith.cmpf oeq, %75, %76 : vector<8x128xf32>
    %cst_27 = arith.constant 0x7F800000 : f32
    %78 = vector.broadcast %cst_27 : f32 to vector<8x128xf32>
    %79 = arith.mulf %78, %17 : vector<8x128xf32>
    %80 = arith.mulf %74, %17 : vector<8x128xf32>
    %81 = arith.select %77, %79, %80 : vector<8x128xi1>, vector<8x128xf32>
    %cst_28 = arith.constant 1.41421354 : f32
    %82 = vector.broadcast %cst_28 : f32 to vector<8x128xf32>
    %83 = arith.mulf %82, %81 : vector<8x128xf32>
    %c0_29 = arith.constant 0 : index
    %c0_30 = arith.constant 0 : index
    %84 = vector.load %arg1[%c0_29, %c0_30] : memref<8x128xf32, #tpu.memory_space<vmem>>, vector<8x128xf32>
    tpu.vector_store %arg1[%c0_29, %c0_30], %83 {strides = array<i32>} : memref<8x128xf32, #tpu.memory_space<vmem>>, vector<8x128xf32>,
    return
  }
}

module attributes {stable_mosaic.version = 11 : i64} {
  func.func @_bayes_linear_kernel(%arg0: i32, %arg1: i32, %arg2: i32, %arg3: memref<1xi32, #tpu.memory_space<smem>>, %arg4: memref<8x32xf32, #tpu.memory_space<vmem>>, %arg5: memref<16x32xf32, #tpu.memory_space<vmem>>, %arg6: memref<16x32xf32, #tpu.memory_space<vmem>>, %arg7: memref<16x32xf32, #tpu.memory_space<vmem>>, %arg8: memref<1x16xf32, #tpu.memory_space<vmem>>, %arg9: memref<1x16xf32, #tpu.memory_space<vmem>>, %arg10: memref<1x16xf32, #tpu.memory_space<vmem>>, %arg11: memref<8x16xf32, #tpu.memory_space<vmem>>, %arg12: memref<1x1x1x1xf32, #tpu.memory_space<vmem>>, %arg13: memref<1x1x1x1xf32, #tpu.memory_space<vmem>>, %arg14: memref<8x16xf32, #tpu.memory_space<vmem>>) attributes {dimension_semantics = [#tpu.dimension_semantics<parallel>, #tpu.dimension_semantics<parallel>, #tpu.dimension_semantics<arbitrary>], iteration_bounds = array<i64: 1, 1, 1>, scalar_prefetch = 1 : i64, scratch_operands = 1 : i64, tpu.core_type = #tpu.core_type<tc>, window_params = [{transform_indices = @transform_0, window_bounds = array<i64: 8, 32>}, {transform_indices = @transform_1, window_bounds = array<i64: 16, 32>}, {transform_indices = @transform_2, window_bounds = array<i64: 16, 32>}, {transform_indices = @transform_3, window_bounds = array<i64: 16, 32>}, {transform_indices = @transform_4, window_bounds = array<i64: 1, 16>}, {transform_indices = @transform_5, window_bounds = array<i64: 1, 16>}, {transform_indices = @transform_6, window_bounds = array<i64: 1, 16>}, {transform_indices = @transform_7, window_bounds = array<i64: 8, 16>}, {transform_indices = @transform_8, window_bounds = array<i64: 1, 1, 1, 1>}, {transform_indices = @transform_9, window_bounds = array<i64: 1, 1, 1, 1>}]} {
    %c0 = arith.constant 0 : index
    %c0_0 = arith.constant 0 : index
    %0 = vector.load %arg6[%c0, %c0_0] : memref<16x32xf32, #tpu.memory_space<vmem>>, vector<16x32xf32>
    %c0_1 = arith.constant 0 : index
    %c0_2 = arith.constant 0 : index
    %1 = vector.load %arg7[%c0_1, %c0_2] : memref<16x32xf32, #tpu.memory_space<vmem>>, vector<16x32xf32>
    %c0_3 = arith.constant 0 : index
    %c0_4 = arith.constant 0 : index
    %2 = vector.load %arg5[%c0_3, %c0_4] : memref<16x32xf32, #tpu.memory_space<vmem>>, vector<16x32xf32>
    %3 = arith.mulf %0, %1 : vector<16x32xf32>
    %4 = arith.addf %2, %3 : vector<16x32xf32>
    %5 = arith.truncf %4 : vector<16x32xf32> to vector<16x32xbf16>
    %c0_i32 = arith.constant 0 : i32
    %6 = arith.cmpi eq, %arg2, %c0_i32 : i32
    %7 = arith.extui %6 : i1 to i32
    %c0_i32_5 = arith.constant 0 : i32
    %8 = arith.cmpi ne, %7, %c0_i32_5 : i32
    scf.if %8 {
      %cst_21 = arith.constant 0.000000e+00 : f32
      %29 = vector.broadcast %cst_21 : f32 to vector<8x16xf32>
      %c0_22 = arith.constant 0 : index
      %c0_23 = arith.constant 0 : index
      %30 = vector.load %arg14[%c0_22, %c0_23] : memref<8x16xf32, #tpu.memory_space<vmem>>, vector<8x16xf32>
      tpu.vector_store %arg14[%c0_22, %c0_23], %29 {strides = array<i32>} : memref<8x16xf32, #tpu.memory_space<vmem>>, vector<8x16xf32>,
    } else {
    }
    %c0_6 = arith.constant 0 : index
    %c0_7 = arith.constant 0 : index
    %9 = vector.load %arg14[%c0_6, %c0_7] : memref<8x16xf32, #tpu.memory_space<vmem>>, vector<8x16xf32>
    %c0_8 = arith.constant 0 : index
    %c0_9 = arith.constant 0 : index
    %10 = vector.load %arg4[%c0_8, %c0_9] : memref<8x32xf32, #tpu.memory_space<vmem>>, vector<8x32xf32>
    %11 = arith.truncf %10 : vector<8x32xf32> to vector<8x32xbf16>
    %cst = arith.constant dense<0.000000e+00> : vector<8x16xf32>
    %12 = tpu.matmul %11, %5, %cst {dimension_numbers = #tpu.dot_dimension_numbers<[1], [1], [0], [0], [0, 0, 1, 0], [], []>} : vector<8x32xbf16>, vector<16x32xbf16>, vector<8x16xf32> -> vector<8x16xf32>
    %13 = arith.addf %9, %12 : vector<8x16xf32>
    %c0_10 = arith.constant 0 : index
    %c0_11 = arith.constant 0 : index
    %14 = vector.load %arg14[%c0_10, %c0_11] : memref<8x16xf32, #tpu.memory_space<vmem>>, vector<8x16xf32>
    tpu.vector_store %arg14[%c0_10, %c0_11], %13 {strides = array<i32>} : memref<8x16xf32, #tpu.memory_space<vmem>>, vector<8x16xf32>,
    %c0_i32_12 = arith.constant 0 : i32
    %15 = arith.cmpi eq, %arg2, %c0_i32_12 : i32
    %16 = arith.extui %15 : i1 to i32
    %c0_i32_13 = arith.constant 0 : i32
    %17 = arith.cmpi ne, %16, %c0_i32_13 : i32
    scf.if %17 {
      %c0_21 = arith.constant 0 : index
      %c0_22 = arith.constant 0 : index
      %29 = vector.load %arg8[%c0_21, %c0_22] : memref<1x16xf32, #tpu.memory_space<vmem>>, vector<1x16xf32>
      %c0_23 = arith.constant 0 : index
      %c0_24 = arith.constant 0 : index
      %30 = vector.load %arg9[%c0_23, %c0_24] : memref<1x16xf32, #tpu.memory_space<vmem>>, vector<1x16xf32>
      %c0_25 = arith.constant 0 : index
      %c0_26 = arith.constant 0 : index
      %31 = vector.load %arg10[%c0_25, %c0_26] : memref<1x16xf32, #tpu.memory_space<vmem>>, vector<1x16xf32>
      %32 = arith.mulf %30, %31 : vector<1x16xf32>
      %33 = arith.addf %29, %32 : vector<1x16xf32>
      %c0_27 = arith.constant 0 : index
      %c0_28 = arith.constant 0 : index
      %34 = vector.load %arg14[%c0_27, %c0_28] : memref<8x16xf32, #tpu.memory_space<vmem>>, vector<8x16xf32>
      %35 = vector.broadcast %33 : vector<1x16xf32> to vector<8x16xf32>
      %36 = arith.addf %34, %35 : vector<8x16xf32>
      %c0_29 = arith.constant 0 : index
      %c0_30 = arith.constant 0 : index
      %37 = vector.load %arg11[%c0_29, %c0_30] : memref<8x16xf32, #tpu.memory_space<vmem>>, vector<8x16xf32>
      tpu.vector_store %arg11[%c0_29, %c0_30], %36 {strides = array<i32>} : memref<8x16xf32, #tpu.memory_space<vmem>>, vector<8x16xf32>,
    } else {
    }
    %c0_i32_14 = arith.constant 0 : i32
    %18 = arith.cmpi eq, %arg2, %c0_i32_14 : i32
    %19 = arith.extui %18 : i1 to i32
    %c0_i32_15 = arith.constant 0 : i32
    %20 = arith.cmpi ne, %19, %c0_i32_15 : i32
    scf.if %20 {
      %cst_21 = arith.constant 0.000000e+00 : f32
      %29 = vector.broadcast %cst_21 : f32 to vector<1x1x1x1xf32>
      %c0_22 = arith.constant 0 : index
      %c0_23 = arith.constant 0 : index
      %c0_24 = arith.constant 0 : index
      %c0_25 = arith.constant 0 : index
      %30 = vector.load %arg12[%c0_22, %c0_23, %c0_24, %c0_25] : memref<1x1x1x1xf32, #tpu.memory_space<vmem>>, vector<1x1x1x1xf32>
      tpu.vector_store %arg12[%c0_22, %c0_23, %c0_24, %c0_25], %29 {strides = array<i32>} : memref<1x1x1x1xf32, #tpu.memory_space<vmem>>, vector<1x1x1x1xf32>,
      %cst_26 = arith.constant 0.000000e+00 : f32
      %31 = vector.broadcast %cst_26 : f32 to vector<1x1x1x1xf32>
      %c0_27 = arith.constant 0 : index
      %c0_28 = arith.constant 0 : index
      %c0_29 = arith.constant 0 : index
      %c0_30 = arith.constant 0 : index
      %32 = vector.load %arg13[%c0_27, %c0_28, %c0_29, %c0_30] : memref<1x1x1x1xf32, #tpu.memory_space<vmem>>, vector<1x1x1x1xf32>
      tpu.vector_store %arg13[%c0_27, %c0_28, %c0_29, %c0_30], %31 {strides = array<i32>} : memref<1x1x1x1xf32, #tpu.memory_space<vmem>>, vector<1x1x1x1xf32>,
    } else {
    }
    %c0_i32_16 = arith.constant 0 : i32
    %21 = arith.cmpi eq, %arg0, %c0_i32_16 : i32
    %22 = arith.extui %21 : i1 to i32
    %c0_i32_17 = arith.constant 0 : i32
    %23 = arith.cmpi ne, %22, %c0_i32_17 : i32
    scf.if %23 {
      %c0_21 = arith.constant 0 : index
      %c0_22 = arith.constant 0 : index
      %c0_23 = arith.constant 0 : index
      %c0_24 = arith.constant 0 : index
      %29 = vector.load %arg12[%c0_21, %c0_22, %c0_23, %c0_24] : memref<1x1x1x1xf32, #tpu.memory_space<vmem>>, vector<1x1x1x1xf32>
      %cst_25 = arith.constant 5.000000e-01 : f32
      %30 = vector.broadcast %cst_25 : f32 to vector<16x32xf32>
      %31 = arith.mulf %30, %4 : vector<16x32xf32>
      %32 = arith.mulf %31, %4 : vector<16x32xf32>
      %cst_26 = arith.constant -0.918938517 : f32
      %33 = vector.broadcast %cst_26 : f32 to vector<16x32xf32>
      %34 = arith.subf %33, %32 : vector<16x32xf32>
      %35 = vector.shape_cast %34 : vector<16x32xf32> to vector<1x16x32xf32>
      %cst_27 = arith.constant dense<0.000000e+00> : vector<1xf32>
      %36 = vector.multi_reduction <add>, %35, %cst_27 [1, 2] : vector<1x16x32xf32> to vector<1xf32>
      %37 = vector.shape_cast %36 : vector<1xf32> to vector<1x1x1xf32>
      %38 = vector.extract %37[0, 0, 0] : f32 from vector<1x1x1xf32>
      %39 = vector.broadcast %38 : f32 to vector<1x1xf32>
      %40 = vector.shape_cast %39 : vector<1x1xf32> to vector<1x1x1x1xf32>
      %41 = arith.addf %29, %40 : vector<1x1x1x1xf32>
      %c0_28 = arith.constant 0 : index
      %c0_29 = arith.constant 0 : index
      %c0_30 = arith.constant 0 : index
      %c0_31 = arith.constant 0 : index
      %42 = vector.load %arg12[%c0_28, %c0_29, %c0_30, %c0_31] : memref<1x1x1x1xf32, #tpu.memory_space<vmem>>, vector<1x1x1x1xf32>
      tpu.vector_store %arg12[%c0_28, %c0_29, %c0_30, %c0_31], %41 {strides = array<i32>} : memref<1x1x1x1xf32, #tpu.memory_space<vmem>>, vector<1x1x1x1xf32>,
      %c0_32 = arith.constant 0 : index
      %c0_33 = arith.constant 0 : index
      %c0_34 = arith.constant 0 : index
      %c0_35 = arith.constant 0 : index
      %43 = vector.load %arg13[%c0_32, %c0_33, %c0_34, %c0_35] : memref<1x1x1x1xf32, #tpu.memory_space<vmem>>, vector<1x1x1x1xf32>
      %44 = math.log %0 : vector<16x32xf32>
      %cst_36 = arith.constant -0.918938517 : f32
      %45 = vector.broadcast %cst_36 : f32 to vector<16x32xf32>
      %46 = arith.subf %45, %44 : vector<16x32xf32>
      %cst_37 = arith.constant 5.000000e-01 : f32
      %47 = vector.broadcast %cst_37 : f32 to vector<16x32xf32>
      %48 = arith.mulf %47, %1 : vector<16x32xf32>
      %49 = arith.mulf %48, %1 : vector<16x32xf32>
      %50 = arith.subf %46, %49 : vector<16x32xf32>
      %51 = vector.shape_cast %50 : vector<16x32xf32> to vector<1x16x32xf32>
      %cst_38 = arith.constant dense<0.000000e+00> : vector<1xf32>
      %52 = vector.multi_reduction <add>, %51, %cst_38 [1, 2] : vector<1x16x32xf32> to vector<1xf32>
      %53 = vector.shape_cast %52 : vector<1xf32> to vector<1x1x1xf32>
      %54 = vector.extract %53[0, 0, 0] : f32 from vector<1x1x1xf32>
      %55 = vector.broadcast %54 : f32 to vector<1x1xf32>
      %56 = vector.shape_cast %55 : vector<1x1xf32> to vector<1x1x1x1xf32>
      %57 = arith.addf %43, %56 : vector<1x1x1x1xf32>
      %c0_39 = arith.constant 0 : index
      %c0_40 = arith.constant 0 : index
      %c0_41 = arith.constant 0 : index
      %c0_42 = arith.constant 0 : index
      %58 = vector.load %arg13[%c0_39, %c0_40, %c0_41, %c0_42] : memref<1x1x1x1xf32, #tpu.memory_space<vmem>>, vector<1x1x1x1xf32>
      tpu.vector_store %arg13[%c0_39, %c0_40, %c0_41, %c0_42], %57 {strides = array<i32>} : memref<1x1x1x1xf32, #tpu.memory_space<vmem>>, vector<1x1x1x1xf32>,
    } else {
    }
    %c0_i32_18 = arith.constant 0 : i32
    %24 = arith.cmpi eq, %arg0, %c0_i32_18 : i32
    %c0_i32_19 = arith.constant 0 : i32
    %25 = arith.cmpi eq, %arg2, %c0_i32_19 : i32
    %26 = arith.andi %24, %25 : i1
    %27 = arith.extui %26 : i1 to i32
    %c0_i32_20 = arith.constant 0 : i32
    %28 = arith.cmpi ne, %27, %c0_i32_20 : i32
    scf.if %28 {
      %c0_21 = arith.constant 0 : index
      %c0_22 = arith.constant 0 : index
      %29 = vector.load %arg9[%c0_21, %c0_22] : memref<1x16xf32, #tpu.memory_space<vmem>>, vector<1x16xf32>
      %c0_23 = arith.constant 0 : index
      %c0_24 = arith.constant 0 : index
      %30 = vector.load %arg10[%c0_23, %c0_24] : memref<1x16xf32, #tpu.memory_space<vmem>>, vector<1x16xf32>
      %c0_25 = arith.constant 0 : index
      %c0_26 = arith.constant 0 : index
      %31 = vector.load %arg8[%c0_25, %c0_26] : memref<1x16xf32, #tpu.memory_space<vmem>>, vector<1x16xf32>
      %32 = arith.mulf %29, %30 : vector<1x16xf32>
      %33 = arith.addf %31, %32 : vector<1x16xf32>
      %c0_27 = arith.constant 0 : index
      %c0_28 = arith.constant 0 : index
      %c0_29 = arith.constant 0 : index
      %c0_30 = arith.constant 0 : index
      %34 = vector.load %arg12[%c0_27, %c0_28, %c0_29, %c0_30] : memref<1x1x1x1xf32, #tpu.memory_space<vmem>>, vector<1x1x1x1xf32>
      %cst_31 = arith.constant 5.000000e-01 : f32
      %35 = vector.broadcast %cst_31 : f32 to vector<1x16xf32>
      %36 = arith.mulf %35, %33 : vector<1x16xf32>
      %37 = arith.mulf %36, %33 : vector<1x16xf32>
      %cst_32 = arith.constant -0.918938517 : f32
      %38 = vector.broadcast %cst_32 : f32 to vector<1x16xf32>
      %39 = arith.subf %38, %37 : vector<1x16xf32>
      %40 = vector.shape_cast %39 : vector<1x16xf32> to vector<1x1x16xf32>
      %cst_33 = arith.constant dense<0.000000e+00> : vector<1xf32>
      %41 = vector.multi_reduction <add>, %40, %cst_33 [1, 2] : vector<1x1x16xf32> to vector<1xf32>
      %42 = vector.shape_cast %41 : vector<1xf32> to vector<1x1x1xf32>
      %43 = vector.extract %42[0, 0, 0] : f32 from vector<1x1x1xf32>
      %44 = vector.broadcast %43 : f32 to vector<1x1xf32>
      %45 = vector.shape_cast %44 : vector<1x1xf32> to vector<1x1x1x1xf32>
      %46 = arith.addf %34, %45 : vector<1x1x1x1xf32>
      %c0_34 = arith.constant 0 : index
      %c0_35 = arith.constant 0 : index
      %c0_36 = arith.constant 0 : index
      %c0_37 = arith.constant 0 : index
      %47 = vector.load %arg12[%c0_34, %c0_35, %c0_36, %c0_37] : memref<1x1x1x1xf32, #tpu.memory_space<vmem>>, vector<1x1x1x1xf32>
      tpu.vector_store %arg12[%c0_34, %c0_35, %c0_36, %c0_37], %46 {strides = array<i32>} : memref<1x1x1x1xf32, #tpu.memory_space<vmem>>, vector<1x1x1x1xf32>,
      %c0_38 = arith.constant 0 : index
      %c0_39 = arith.constant 0 : index
      %c0_40 = arith.constant 0 : index
      %c0_41 = arith.constant 0 : index
      %48 = vector.load %arg13[%c0_38, %c0_39, %c0_40, %c0_41] : memref<1x1x1x1xf32, #tpu.memory_space<vmem>>, vector<1x1x1x1xf32>
      %49 = math.log %29 : vector<1x16xf32>
      %cst_42 = arith.constant -0.918938517 : f32
      %50 = vector.broadcast %cst_42 : f32 to vector<1x16xf32>
      %51 = arith.subf %50, %49 : vector<1x16xf32>
      %cst_43 = arith.constant 5.000000e-01 : f32
      %52 = vector.broadcast %cst_43 : f32 to vector<1x16xf32>
      %53 = arith.mulf %52, %30 : vector<1x16xf32>
      %54 = arith.mulf %53, %30 : vector<1x16xf32>
      %55 = arith.subf %51, %54 : vector<1x16xf32>
      %56 = vector.shape_cast %55 : vector<1x16xf32> to vector<1x1x16xf32>
      %cst_44 = arith.constant dense<0.000000e+00> : vector<1xf32>
      %57 = vector.multi_reduction <add>, %56, %cst_44 [1, 2] : vector<1x1x16xf32> to vector<1xf32>
      %58 = vector.shape_cast %57 : vector<1xf32> to vector<1x1x1xf32>
      %59 = vector.extract %58[0, 0, 0] : f32 from vector<1x1x1xf32>
      %60 = vector.broadcast %59 : f32 to vector<1x1xf32>
      %61 = vector.shape_cast %60 : vector<1x1xf32> to vector<1x1x1x1xf32>
      %62 = arith.addf %48, %61 : vector<1x1x1x1xf32>
      %c0_45 = arith.constant 0 : index
      %c0_46 = arith.constant 0 : index
      %c0_47 = arith.constant 0 : index
      %c0_48 = arith.constant 0 : index
      %63 = vector.load %arg13[%c0_45, %c0_46, %c0_47, %c0_48] : memref<1x1x1x1xf32, #tpu.memory_space<vmem>>, vector<1x1x1x1xf32>
      tpu.vector_store %arg13[%c0_45, %c0_46, %c0_47, %c0_48], %62 {strides = array<i32>} : memref<1x1x1x1xf32, #tpu.memory_space<vmem>>, vector<1x1x1x1xf32>,
    } else {
    }
    return
  }
  func.func @transform_0(%arg0: i32, %arg1: i32, %arg2: i32, %arg3: memref<1xi32, #tpu.memory_space<smem>>) -> (i32, i32) {
    %c0_i32 = arith.constant 0 : i32
    return %arg0, %arg2 : i32, i32
  }
  func.func @transform_1(%arg0: i32, %arg1: i32, %arg2: i32, %arg3: memref<1xi32, #tpu.memory_space<smem>>) -> (i32, i32) {
    %c0_i32 = arith.constant 0 : i32
    return %arg1, %arg2 : i32, i32
  }
  func.func @transform_2(%arg0: i32, %arg1: i32, %arg2: i32, %arg3: memref<1xi32, #tpu.memory_space<smem>>) -> (i32, i32) {
    %c0_i32 = arith.constant 0 : i32
    return %arg1, %arg2 : i32, i32
  }
  func.func @transform_3(%arg0: i32, %arg1: i32, %arg2: i32, %arg3: memref<1xi32, #tpu.memory_space<smem>>) -> (i32, i32) {
    %c0_i32 = arith.constant 0 : i32
    return %arg1, %arg2 : i32, i32
  }
  func.func @transform_4(%arg0: i32, %arg1: i32, %arg2: i32, %arg3: memref<1xi32, #tpu.memory_space<smem>>) -> (i32, i32) {
    %c0_i32 = arith.constant 0 : i32
    %c0_i32_0 = arith.constant 0 : i32
    return %c0_i32, %arg1 : i32, i32
  }
  func.func @transform_5(%arg0: i32, %arg1: i32, %arg2: i32, %arg3: memref<1xi32, #tpu.memory_space<smem>>) -> (i32, i32) {
    %c0_i32 = arith.constant 0 : i32
    %c0_i32_0 = arith.constant 0 : i32
    return %c0_i32, %arg1 : i32, i32
  }
  func.func @transform_6(%arg0: i32, %arg1: i32, %arg2: i32, %arg3: memref<1xi32, #tpu.memory_space<smem>>) -> (i32, i32) {
    %c0_i32 = arith.constant 0 : i32
    %c0_i32_0 = arith.constant 0 : i32
    return %c0_i32, %arg1 : i32, i32
  }
  func.func @transform_7(%arg0: i32, %arg1: i32, %arg2: i32, %arg3: memref<1xi32, #tpu.memory_space<smem>>) -> (i32, i32) {
    %c0_i32 = arith.constant 0 : i32
    return %arg0, %arg1 : i32, i32
  }
  func.func @transform_8(%arg0: i32, %arg1: i32, %arg2: i32, %arg3: memref<1xi32, #tpu.memory_space<smem>>) -> (i32, i32, i32, i32) {
    %c0_i32 = arith.constant 0 : i32
    %c0_i32_0 = arith.constant 0 : i32
    %c0_i32_1 = arith.constant 0 : i32
    return %arg0, %arg1, %c0_i32, %c0_i32_0 : i32, i32, i32, i32
  }
  func.func @transform_9(%arg0: i32, %arg1: i32, %arg2: i32, %arg3: memref<1xi32, #tpu.memory_space<smem>>) -> (i32, i32, i32, i32) {
    %c0_i32 = arith.constant 0 : i32
    %c0_i32_0 = arith.constant 0 : i32
    %c0_i32_1 = arith.constant 0 : i32
    return %arg0, %arg1, %c0_i32, %c0_i32_0 : i32, i32, i32, i32
  }
}

</mosaic_0001>

<bundles_post_ra>
// kernel: tpu_custom_call.1
= control target key start
LH: loop header
LB: loop body
LE: loop exit
PB: predicated region body
PF: predicated region fallthrough
CT: control target
= control target key end

     0   :  { %7 = vsyncpa [#allocation4], 0  ;;  %v11_v0 = vlaneseq  ;;  %s320_s0 = inlined_call_operand.<no memory space> [shape: s32[1], index: 0, kind: input, shape index: {}]   ;;  %s321_s1 = inlined_call_operand.hbm [shape: f32[8,128], index: 1, kind: output, shape index: {}]  }
   0x1   :  { %v274_v1 = vstv %s320_s0  ;;  %s260_s0 = smov [#allocation3]  }
   0x2   :  { %v15_v2 = vadd.s32 %v274_v1, %v11_v0  ;;  %v13_v17 = vxor.u32 %v274_v1, %v274_v1  ;;  %s202_s8 = sshll.u32 %s260_s0, 4  ;;  %s203_s8 = int_to_ptr.vmem [resolvable:$true] %s202_s8 }
   0x3   :  { %s227_s9 = scalar_lea.vmem %s203_s8, 128  ;;  %p232_p1 = scmp.lt.s32.totalorder %s203_s8, %s203_s8 }
   0x4   :  { %v16_v3 = vadd.s32 %v15_v2, %v15_v2  ;;  %v17_v4 = vshll.u32 %v15_v2, 13  ;;  %v18_v5 = vshrl.u32 %v15_v2, 19  ;;  %v279_v22 = vxor.u32 466688986, %v13_v17  ;;  %p228_p0 = scmp.ne.s32.totalorder %s203_s8, %s227_s9  ;;  %p233_p2 = scmp.lt.s32.totalorder %s227_s9, %s227_s9 }
   0x6   :  { %v19_v6 = vor.u32 %v18_v5, %v17_v4  ;;  %p234_p3 = por %p233_p2, %p232_p1 }
   0x8   :  { %v20_v7 = vxor.u32 %v19_v6, %v16_v3  ;;  %p235_p4 = pnand %p234_p3, %p228_p0 }
   0xa   :  { %v21_v8 = vadd.s32 %v20_v7, %v16_v3  ;;  %v22_v9 = vshll.u32 %v20_v7, 15  ;;  %v23_v10 = vshrl.u32 %v20_v7, 17 }
   0xc   :  { %v24_v11 = vor.u32 %v23_v10, %v22_v9 }
   0xe   :  { %v25_v12 = vxor.u32 %v24_v11, %v21_v8 }
  0x10   :  { %v26_v13 = vadd.s32 %v25_v12, %v21_v8  ;;  %v27_v14 = vshll.u32 %v25_v12, 26  ;;  %v28_v15 = vshrl.u32 %v25_v12, 6 }
  0x12   :  { %v29_v16 = vor.u32 %v28_v15, %v27_v14 }
  0x14   :  { %v30_v18 = vxor.u32 %v29_v16, %v26_v13 }
  0x16   :  { %v31_v19 = vadd.s32 %v30_v18, %v26_v13  ;;  %v32_v20 = vshll.u32 %v30_v18, 6  ;;  %v33_v21 = vshrl.u32 %v30_v18, 26 }
  0x18   :  { %v34_v23 = vor.u32 %v33_v21, %v32_v20  ;;  %v36_v25 = vadd.s32 %v31_v19, %v274_v1 }
  0x1a   :  { %v35_v24 = vxor.u32 %v34_v23, %v31_v19 }
  0x1c   :  { %v37_v26 = vadd.s32 %v35_v24, %v279_v22 }
  0x1e   :  { %v38_v27 = vadd.s32 1, %v37_v26 }
  0x20   :  { %v39_v28 = vadd.s32 %v38_v27, %v36_v25  ;;  %v40_v29 = vshll.u32 %v38_v27, 17  ;;  %v41_v30 = vshrl.u32 %v38_v27, 15 }
  0x22   :  { %v42_v31 = vor.u32 %v41_v30, %v40_v29 }
  0x24   :  { %v43_v32 = vxor.u32 %v42_v31, %v39_v28 }
  0x26   :  { %v44_v33 = vadd.s32 %v43_v32, %v39_v28  ;;  %v45_v34 = vshll.u32 %v43_v32, 29  ;;  %v46_v35 = vshrl.u32 %v43_v32, 3 }
  0x28   :  { %v47_v36 = vor.u32 %v46_v35, %v45_v34 }
  0x2a   :  { %v48_v37 = vxor.u32 %v47_v36, %v44_v33 }
  0x2c   :  { %v49_v38 = vadd.s32 %v48_v37, %v44_v33  ;;  %v50_v39 = vshll.u32 %v48_v37, 16  ;;  %v51_v40 = vshrl.u32 %v48_v37, 16 }
  0x2e   :  { %v52_v41 = vor.u32 %v51_v40, %v50_v39 }
  0x30   :  { %v53_v42 = vxor.u32 %v52_v41, %v49_v38 }
  0x32   :  { %v54_v43 = vadd.s32 %v53_v42, %v49_v38  ;;  %v55_v44 = vshll.u32 %v53_v42, 24  ;;  %v56_v45 = vshrl.u32 %v53_v42, 8 }
  0x34   :  { %v57_v46 = vor.u32 %v56_v45, %v55_v44  ;;  %v59_v48 = vadd.s32 %v54_v43, %v279_v22 }
  0x36   :  { %v58_v47 = vxor.u32 %v57_v46, %v54_v43 }
  0x38   :  { %v60_v49 = vadd.s32 %v58_v47, %v274_v1 }
  0x3a   :  { %v61_v50 = vadd.s32 2, %v60_v49 }
  0x3c   :  { %v62_v51 = vadd.s32 %v61_v50, %v59_v48  ;;  %v63_v52 = vshll.u32 %v61_v50, 13  ;;  %v64_v53 = vshrl.u32 %v61_v50, 19 }
  0x3e   :  { %v65_v54 = vor.u32 %v64_v53, %v63_v52 }
  0x40   :  { %v66_v55 = vxor.u32 %v65_v54, %v62_v51 }
  0x42   :  { %v67_v56 = vadd.s32 %v66_v55, %v62_v51  ;;  %v68_v57 = vshll.u32 %v66_v55, 15  ;;  %v69_v58 = vshrl.u32 %v66_v55, 17 }
  0x44   :  { %v70_v59 = vor.u32 %v69_v58, %v68_v57 }
  0x46   :  { %v71_v60 = vxor.u32 %v70_v59, %v67_v56 }
  0x48   :  { %v72_v61 = vadd.s32 %v71_v60, %v67_v56  ;;  %v73_v62 = vshll.u32 %v71_v60, 26  ;;  %v74_v63 = vshrl.u32 %v71_v60, 6 }
  0x4a   :  { %v75_v0 = vor.u32 %v74_v63, %v73_v62 }
  0x4c   :  { %v76_v2 = vxor.u32 %v75_v0, %v72_v61 }
  0x4e   :  { %v77_v3 = vadd.s32 %v76_v2, %v72_v61  ;;  %v78_v4 = vshll.u32 %v76_v2, 6  ;;  %v79_v5 = vshrl.u32 %v76_v2, 26 }
  0x50   :  { %v80_v6 = vor.u32 %v79_v5, %v78_v4  ;;  %v82_v8 = vadd.s32 %v77_v3, %v274_v1 }
  0x52   :  { %v81_v7 = vxor.u32 %v80_v6, %v77_v3 }
  0x54   :  { %v83_v9 = vadd.s32 %v81_v7, %v274_v1 }
  0x56   :  { %v84_v10 = vadd.s32 3, %v83_v9 }
  0x58   :  { %v85_v11 = vadd.s32 %v84_v10, %v82_v8  ;;  %v86_v12 = vshll.u32 %v84_v10, 17  ;;  %v87_v13 = vshrl.u32 %v84_v10, 15 }
  0x5a   :  { %v88_v14 = vor.u32 %v87_v13, %v86_v12 }
  0x5c   :  { %v89_v15 = vxor.u32 %v88_v14, %v85_v11 }
  0x5e   :  { %v90_v16 = vadd.s32 %v89_v15, %v85_v11  ;;  %v91_v17 = vshll.u32 %v89_v15, 29  ;;  %v92_v18 = vshrl.u32 %v89_v15, 3 }
  0x60   :  { %v93_v19 = vor.u32 %v92_v18, %v91_v17 }
  0x62   :  { %v94_v20 = vxor.u32 %v93_v19, %v90_v16 }
  0x64   :  { %v95_v21 = vadd.s32 %v94_v20, %v90_v16  ;;  %v96_v23 = vshll.u32 %v94_v20, 16  ;;  %v97_v24 = vshrl.u32 %v94_v20, 16  ;;  %v251_v20 = vmov -0.00020021426  }
  0x66   :  { %v98_v25 = vor.u32 %v97_v24, %v96_v23  ;;  %v252_v24 = vmov 0.00010095056  }
  0x68   :  { %v99_v26 = vxor.u32 %v98_v25, %v95_v21 }
  0x6a   :  { %v100_v27 = vadd.s32 %v99_v26, %v95_v21  ;;  %v101_v28 = vshll.u32 %v99_v26, 24  ;;  %v102_v29 = vshrl.u32 %v99_v26, 8 }
  0x6c   :  { %v103_v30 = vor.u32 %v102_v29, %v101_v28  ;;  %v105_v32 = vadd.s32 %v100_v27, %v274_v1  ;;  %v253_v28 = vmov 0.0013493432  }
  0x6e   :  { %v104_v31 = vxor.u32 %v103_v30, %v100_v27 }
  0x70   :  { %v106_v33 = vadd.s32 %v104_v31, %v279_v22 }
  0x72   :  { %v107_v34 = vadd.s32 4, %v106_v33 }
  0x74   :  { %v108_v35 = vadd.s32 %v107_v34, %v105_v32  ;;  %v109_v36 = vshll.u32 %v107_v34, 13  ;;  %v110_v37 = vshrl.u32 %v107_v34, 19  ;;  %v254_v32 = vmov -0.0036734284  }
  0x76   :  { %v111_v38 = vor.u32 %v110_v37, %v109_v36  ;;  %v255_v36 = vmov 0.0057395077  }
  0x78   :  { %v112_v39 = vxor.u32 %v111_v38, %v108_v35 }
  0x7a   :  { %v113_v40 = vadd.s32 %v112_v39, %v108_v35  ;;  %v114_v41 = vshll.u32 %v112_v39, 15  ;;  %v115_v42 = vshrl.u32 %v112_v39, 17 }
  0x7c   :  { %v116_v43 = vor.u32 %v115_v42, %v114_v41 }
  0x7e   :  { %v117_v44 = vxor.u32 %v116_v43, %v113_v40 }
  0x80   :  { %v118_v45 = vadd.s32 %v117_v44, %v113_v40  ;;  %v119_v46 = vshll.u32 %v117_v44, 26  ;;  %v120_v47 = vshrl.u32 %v117_v44, 6  ;;  %v256_v40 = vmov -0.0076224613  }
  0x81   :  { %v257_v44 = vmov 0.0094388705  }
  0x82   :  { %v121_v48 = vor.u32 %v120_v47, %v119_v46 }
  0x84   :  { %v122_v49 = vxor.u32 %v121_v48, %v118_v45  ;;  %v258_v48 = vmov 1.001674  }
  0x86   :  { %v123_v50 = vadd.s32 %v122_v49, %v118_v45  ;;  %v124_v51 = vshll.u32 %v122_v49, 6  ;;  %v125_v52 = vshrl.u32 %v122_v49, 26 }
  0x88   :  { %v126_v53 = vor.u32 %v125_v52, %v124_v51  ;;  %v128_v55 = vadd.s32 %v123_v50, %v279_v22  ;;  %v259_v52 = vmov 2.8329768  }
  0x8a   :  { %v127_v54 = vxor.u32 %v126_v53, %v123_v50 }
  0x8c   :  { %v129_v56 = vadd.s32 %v127_v54, %v274_v1 }
  0x8e   :  { %v130_v57 = vadd.s32 5, %v129_v56 }
  0x90   :  { %v131_v58 = vxor.u32 %v130_v57, %v128_v55 }
  0x92   :  { %132 = set.rngseed %v131_v58 }
  0x93   :  { %v133_v59 = vrng }
  0x94   :  { %v134_v60 = vshrl.u32 %v133_v59, 9 }
  0x96   :  { %v135_v61 = vor.u32 1065353216, %v134_v60 }
  0x98   :  { %v210_v62 = vadd.f32 -1.0, %v135_v61 }
  0x9a   :  { %v138_v63 = vmul.f32 2.0, %v210_v62 }
  0x9c   :  { %v139_v0 = vadd.f32 -0.99999994, %v138_v63 }
  0x9e   :  { %v291_v2 = vmax.f32 %v139_v0, -0.99999994 }
  0xa0   :  { %v141_v3 = vsub.f32 0.0, %v291_v2  ;;  %v189_v54 = vand.u32 2147483647, %v291_v2  ;;  %v191_v56 = vmul.f32 inf, %v291_v2 }
  0xa2   :  { %v142_v4 = vmul.f32 %v141_v3, %v291_v2  ;;  %vm190_vm4 = vcmp.eq.f32.partialorder %v189_v54, 1.0 }
  0xa4   :  { %v143_v5 = vadd.f32 1.0, %v142_v4  ;;  %v146_v22 = vmul.f32 -0.5, %v142_v4  ;;  %v149_v1 = vand.u32 2147483647, %v142_v4 }
  0xa6   :  { %223 = vlog2.f32 %v143_v5  ;;  %v147_v6 = vadd.f32 1.0, %v146_v22  ;;  %vm150_vm0 = vcmp.lt.f32.partialorder %v149_v1, 0.0004427343 }
  0xa8   :  { %v148_v9 = vmul.f32 %v147_v6, %v142_v4 }
  0xb0   :  { %v224_v7 = vpop.eup %223 }
  0xb1   :  { %v145_v8 = vmul.f32 0.6931472, %v224_v7 }
  0xb3   :  { %v151_v10 = vsel %vm150_vm0, %v148_v9, %v145_v8 }
  0xb4   :  { %v152_v11 = vsub.f32 0.0, %v151_v10 }
  0xb6   :  { %225 = vrsqrt.f32 %v152_v11  ;;  %vm157_vm1 = vcmp.eq.f32.partialorder %v152_v11, inf  ;;  %v160_v14 = vand.u32 2147483648, %v152_v11  ;;  %vm159_vm2 = vcmp.eq.f32.partialorder %v152_v11, 0.0 }
  0xb7   :  { %vm153_vm3 = vcmp.lt.f32.partialorder %v152_v11, 5.0  ;;  %v211_v17 = vadd.f32 -2.5, %v152_v11 }
  0xb8   :  { %v164_v21 = vsel %vm153_vm3, 2.8102264e-08, %v251_v20  ;;  %v165_v25 = vsel %vm153_vm3, 3.4327394e-07, %v252_v24  ;;  %v168_v29 = vsel %vm153_vm3, -3.5233877e-06, %v253_v28 }
  0xb9   :  { %v171_v33 = vsel %vm153_vm3, -4.3915065e-06, %v254_v32  ;;  %v174_v37 = vsel %vm153_vm3, 0.00021858087, %v255_v36  ;;  %v177_v41 = vsel %vm153_vm3, -0.001253725, %v256_v40 }
  0xba   :  { %v180_v45 = vsel %vm153_vm3, -0.0041776816, %v257_v44  ;;  %v183_v49 = vsel %vm153_vm3, 0.24664073, %v258_v48  ;;  %v186_v53 = vsel %vm153_vm3, 1.5014094, %v259_v52 }
  0xc0   :  { %v226_v12 = vpop.eup %225 }
  0xc1   :  { %v156_v13 = vmul.f32 %v226_v12, %v152_v11 }
  0xc3   :  { %v158_v15 = vsel %vm157_vm1, %v152_v11, %v156_v13 }
  0xc4   :  { %v161_v16 = vsel %vm159_vm2, %v160_v14, %v158_v15 }
  0xc5   :  { %v212_v18 = vadd.f32 -3.0, %v161_v16 }
  0xc7   :  { %v163_v19 = vsel %vm153_vm3, %v211_v17, %v212_v18 }
  0xc8   :  { %v166_v23 = vmul.f32 %v164_v21, %v163_v19 }
  0xca   :  { %v167_v26 = vadd.f32 %v166_v23, %v165_v25 }
  0xcc   :  { %v169_v27 = vmul.f32 %v167_v26, %v163_v19 }
  0xce   :  { %v170_v30 = vadd.f32 %v169_v27, %v168_v29 }
  0xd0   :  { %v172_v31 = vmul.f32 %v170_v30, %v163_v19 }
  0xd2   :  { %v173_v34 = vadd.f32 %v172_v31, %v171_v33 }
  0xd4   :  { %v175_v35 = vmul.f32 %v173_v34, %v163_v19 }
  0xd6   :  { %v176_v38 = vadd.f32 %v175_v35, %v174_v37 }
  0xd8   :  { %v178_v39 = vmul.f32 %v176_v38, %v163_v19 }
  0xda   :  { %v179_v42 = vadd.f32 %v178_v39, %v177_v41 }
  0xdc   :  { %v181_v43 = vmul.f32 %v179_v42, %v163_v19 }
  0xde   :  { %v182_v46 = vadd.f32 %v181_v43, %v180_v45 }
  0xe0   :  { %v184_v47 = vmul.f32 %v182_v46, %v163_v19 }
  0xe2   :  { %v185_v50 = vadd.f32 %v184_v47, %v183_v49 }
  0xe4   :  { %v187_v51 = vmul.f32 %v185_v50, %v163_v19 }
  0xe6   :  { %v188_v55 = vadd.f32 %v187_v51, %v186_v53 }
  0xe8   :  { %v192_v57 = vmul.f32 %v188_v55, %v291_v2 }
  0xea   :  { %v193_v58 = vsel %vm190_vm4, %v191_v56, %v192_v57 }
  0xeb   :  { %v194_v59 = vmul.f32 1.4142135, %v193_v58 }
  0xed   :  { %195 = vst [vmem:[#allocation3] sm:$0xff] %v194_v59 }
  0xee   :  { %238 = shalt.err (!%p235_p4)
}
  0xef   :  { %s239_s12 = scalar_lea.hbm %s321_s1, 128 }
  0xf0   :  { %p240_p5 = scmp.ne.s32.totalorder %s321_s1, %s239_s12  ;;  %p243_p6 = scmp.lt.u32.totalorder %s239_s12, %s321_s1 }
  0xf2   :  { %p245_p7 = pnand %p243_p6, %p240_p5 }
  0xf4   :  { %248 = shalt.err (!%p245_p7)
}
  0xf5   :  { %205 = dma.vmem_to_hbm [thread:$0]  %s203_s8, 128, %s321_s1, [#allocation4]  }
  0xf6   :  { %249 = dma.done.wait [#allocation4], 128  }
  0xf7   :  { %250 = vsyncadd [#allocation4], 4294967168 }
  0xf8   :  { %209 = vsyncpa [#allocation4], 1 }

// kernel: tpu_custom_call.1
= control target key start
LH: loop header
LB: loop body
LE: loop exit
PB: predicated region body
PF: predicated region fallthrough
CT: control target
= control target key end

     0   :  { %17 = vsyncpa [#allocation6], 0  ;;  %s728_s0 = inlined_call_operand.<no memory space> [shape: s32[1], index: 0, kind: input, shape index: {}]   ;;  %s729_s1 = inlined_call_operand.hbm [shape: f32[8,32], index: 1, kind: input, shape index: {}]   ;;  %s730_s2 = inlined_call_operand.hbm [shape: f32[16,32], index: 2, kind: input, shape index: {}]   ;;  %s731_s3 = inlined_call_operand.hbm [shape: f32[16,32], index: 3, kind: input, shape index: {}]   ;;  %s732_s4 = inlined_call_operand.hbm [shape: f32[16,32], index: 4, kind: input, shape index: {}]   ;;  %s733_s5 = inlined_call_operand.vmem [shape: f32[1,16], index: 5, kind: input, shape index: {}]   ;;  %s734_s6 = inlined_call_operand.vmem [shape: f32[1,16], index: 6, kind: input, shape index: {}]   ;;  %s735_s7 = inlined_call_operand.vmem [shape: f32[1,16], index: 7, kind: input, shape index: {}]   ;;  %s736_s8 = inlined_call_operand.hbm [shape: f32[8,16], index: 8, kind: output, shape index: {0}]   ;;  %s737_s9 = inlined_call_operand.hbm [shape: f32[1,1,1,1], index: 9, kind: output, shape index: {1}]   ;;  %s738_s10 = inlined_call_operand.hbm [shape: f32[1,1,1,1], index: 10, kind: output, shape index: {2}]  }
   0x1   :  { %18 = vsyncpa [#allocation9], 0 }
   0x2   :  { %19 = vsyncpa [#allocation12], 0 }
   0x3   :  { %20 = vsyncpa [#allocation7], 0 }
   0x4   :  { %21 = vsyncpa [#allocation15], 0  ;;  %s522_s12 = smov [#allocation8]   ;;  %s358_s16 = scalar_lea.hbm %s730_s2, 256 }
   0x5   :  { %s37_s13 = sshll.u32 %s522_s12, 4  ;;  %p359_p0 = scmp.ne.s32.totalorder %s730_s2, %s358_s16  ;;  %s38_s13 = int_to_ptr.vmem [resolvable:$true] %s37_s13 }
   0x6   :  { %p362_p1 = scmp.lt.u32.totalorder %s358_s16, %s730_s2 }
   0x8   :  { %p364_p2 = pnand %p362_p1, %p359_p0 }
   0xa   :  { %367 = shalt.err (!%p364_p2)
}
   0xb   :  { %s368_s21 = scalar_lea.vmem %s38_s13, 256  ;;  %p373_p4 = scmp.lt.s32.totalorder %s38_s13, %s38_s13 }
   0xc   :  { %p369_p3 = scmp.ne.s32.totalorder %s38_s13, %s368_s21  ;;  %p374_p5 = scmp.lt.s32.totalorder %s368_s21, %s368_s21 }
   0xe   :  { %p375_p6 = por %p374_p5, %p373_p4 }
  0x10   :  { %p376_p7 = pnand %p375_p6, %p369_p3 }
  0x12   :  { %379 = shalt.err (!%p376_p7)
}
  0x13   :  { %s523_s22 = smov 128   ;;  %s524_s23 = smov 8  }
  0x14   :  { %43 = dma.hbm_to_vmem [thread:$0]  %s730_s2, 256, %s38_s13, [#allocation9], %s523_s22, %s523_s22, %s524_s23  }
  0x15   :  { %s525_s0 = smov [#allocation5]   ;;  %s526_s27 = smov [#allocation10]  }
  0x16   :  { %s28_s26 = sshll.u32 %s525_s0, 4  ;;  %s49_s28 = sshll.u32 %s526_s27, 4  ;;  %s29_s26 = int_to_ptr.vmem [resolvable:$true] %s28_s26  ;;  %s50_s28 = int_to_ptr.vmem [resolvable:$true] %s49_s28 }
  0x17   :  { %s380_s11 = scalar_lea.hbm %s729_s1, 128 }
  0x18   :  { %p381_p8 = scmp.ne.s32.totalorder %s729_s1, %s380_s11  ;;  %p384_p9 = scmp.lt.u32.totalorder %s380_s11, %s729_s1 }
  0x1a   :  { %p386_p10 = pnand %p384_p9, %p381_p8 }
  0x1c   :  { %389 = shalt.err (!%p386_p10)
}
  0x1d   :  { %s390_s2 = scalar_lea.vmem %s29_s26, 128  ;;  %p395_p12 = scmp.lt.s32.totalorder %s29_s26, %s29_s26 }
  0x1e   :  { %p391_p11 = scmp.ne.s32.totalorder %s29_s26, %s390_s2  ;;  %p396_p13 = scmp.lt.s32.totalorder %s390_s2, %s390_s2 }
  0x20   :  { %p397_p0 = por %p396_p13, %p395_p12 }
  0x22   :  { %p398_p1 = pnand %p397_p0, %p391_p11 }
  0x24   :  { %401 = shalt.err (!%p398_p1)
}
  0x25   :  { %31 = dma.hbm_to_vmem [thread:$0]  %s729_s1, 128, %s29_s26, [#allocation6]  }
  0x26   :  { %s402_s20 = scalar_lea.hbm %s731_s3, 256 }
  0x27   :  { %p403_p2 = scmp.ne.s32.totalorder %s731_s3, %s402_s20  ;;  %p406_p3 = scmp.lt.u32.totalorder %s402_s20, %s731_s3 }
  0x29   :  { %p408_p4 = pnand %p406_p3, %p403_p2 }
  0x2b   :  { %411 = shalt.err (!%p408_p4)
}
  0x2c   :  { %s412_s27 = scalar_lea.vmem %s50_s28, 256  ;;  %p417_p6 = scmp.lt.s32.totalorder %s50_s28, %s50_s28 }
  0x2d   :  { %p413_p5 = scmp.ne.s32.totalorder %s50_s28, %s412_s27  ;;  %p418_p7 = scmp.lt.s32.totalorder %s412_s27, %s412_s27 }
  0x2f   :  { %p419_p8 = por %p418_p7, %p417_p6 }
  0x31   :  { %p420_p9 = pnand %p419_p8, %p413_p5 }
  0x33   :  { %423 = shalt.err (!%p420_p9)
}
  0x34   :  { %55 = dma.hbm_to_vmem [thread:$0]  %s731_s3, 256, %s50_s28, [#allocation9], %s523_s22, %s523_s22, %s524_s23  }
  0x35   :  { %s527_s29 = smov [#allocation11]   ;;  %s424_s14 = scalar_lea.hbm %s732_s4, 256 }
  0x36   :  { %s61_s30 = sshll.u32 %s527_s29, 4  ;;  %p425_p10 = scmp.ne.s32.totalorder %s732_s4, %s424_s14  ;;  %s62_s30 = int_to_ptr.vmem [resolvable:$true] %s61_s30 }
  0x37   :  { %p428_p11 = scmp.lt.u32.totalorder %s424_s14, %s732_s4 }
  0x39   :  { %p430_p12 = pnand %p428_p11, %p425_p10 }
  0x3b   :  { %433 = shalt.err (!%p430_p12)
}
  0x3c   :  { %s434_s17 = scalar_lea.vmem %s62_s30, 256  ;;  %p439_p0 = scmp.lt.s32.totalorder %s62_s30, %s62_s30 }
  0x3d   :  { %p435_p13 = scmp.ne.s32.totalorder %s62_s30, %s434_s17  ;;  %p440_p1 = scmp.lt.s32.totalorder %s434_s17, %s434_s17 }
  0x3f   :  { %p441_p2 = por %p440_p1, %p439_p0 }
  0x41   :  { %p442_p3 = pnand %p441_p2, %p435_p13 }
  0x43   :  { %445 = shalt.err (!%p442_p3)
}
  0x44   :  { %67 = dma.hbm_to_vmem [thread:$0]  %s732_s4, 256, %s62_s30, [#allocation12], %s523_s22, %s523_s22, %s524_s23  }
  0x45   :  { %512 = dma.done.wait [#allocation6], 128  }
  0x46   :  { %513 = vsyncadd [#allocation6], 4294967168 }
  0x47   :  { %514 = dma.done.wait [#allocation9], 512  }
  0x48   :  { %515 = vsyncadd [#allocation9], 4294966784 }
  0x49   :  { %516 = dma.done.wait [#allocation12], 256  }
  0x4a   :  { %517 = vsyncadd [#allocation12], 4294967040  ;;  %v528_v0 = vmov 0.0   ;;  %vm529_vm0 = vmmov 0   ;;  %v87_v1 = vld [vmem:[#allocation10] sm:$0xff]  ;;  %v88_v2 = vld [vmem:[#allocation10 + $0x8] sm:$0xff] }
  0x4b   :  { %327 = vmatprep.subr.bf16.mxu0 %v528_v0  ;;  %329 = vmatprep.mubr.msk.bf16.mxu0 %vm529_vm0, %v528_v0  ;;  %v89_v3 = vld [vmem:[#allocation11] sm:$0xff]  ;;  %v90_v4 = vld [vmem:[#allocation11 + $0x8] sm:$0xff]  ;;  %352 = vlog2.f32 %v87_v1  ;;  %v236_v9 = vld [vmem:[%s734_s6] sm:$0x1]  ;;  %vm107_vm1 = vcmask 261120   ;;  %vm245_vm2 = vcmask 122880  }
  0x4c   :  { %v91_v5 = vld [vmem:[#allocation8] sm:$0xff]  ;;  %v92_v6 = vld [vmem:[#allocation8 + $0x8] sm:$0xff]  ;;  %v93_v7 = vmul.f32 %v89_v3, %v87_v1  ;;  %v94_v8 = vmul.f32 %v90_v4, %v88_v2  ;;  %354 = vlog2.f32 %v88_v2  ;;  %v237_v10 = vld [vmem:[%s735_s7] sm:$0x1]  ;;  %v211_v23 = vmul.f32 0.5, %v89_v3  ;;  %s530_s29 = smov [#allocation14]  }
  0x4d   :  { %v238_v12 = vld [vmem:[%s733_s5] sm:$0x1]  ;;  %v239_v13 = vmul.f32 %v237_v10, %v236_v9  ;;  %356 = vlog2.f32 %v236_v9  ;;  %v105_v25 = vld [vmem:[#allocation5] sm:$0xff]  ;;  %v212_v26 = vmul.f32 0.5, %v90_v4  ;;  %v264_v32 = vmul.f32 0.5, %v237_v10  ;;  %s296_s30 = sshll.u32 %s530_s29, 4  ;;  %s297_s30 = int_to_ptr.vmem [resolvable:$true] %s296_s30 }
  0x4e   :  { %v95_v11 = vadd.f32 %v93_v7, %v91_v5  ;;  %v96_v14 = vadd.f32 %v94_v8, %v92_v6  ;;  %v106_v35 = vpack.c.bf16 %v105_v25, %v105_v25  ;;  %v213_v37 = vmul.f32 %v211_v23, %v89_v3  ;;  %v161_v23 = vld [vmem:[%s734_s6] sm:$0x1]  ;;  %p451_p5 = scmp.lt.s32.totalorder %s297_s30, %s297_s30 }
  0x4f   :  { %v240_v16 = vadd.f32 %v239_v13, %v238_v12  ;;  %v214_v40 = vmul.f32 %v212_v26, %v90_v4  ;;  %v265_v46 = vmul.f32 %v264_v32, %v237_v10  ;;  %vm174_vm3 = vcmask 0   ;;  %v160_v32 = vld [vmem:[%s733_s5] sm:$0x1]  ;;  %s450_s5 = scalar_lea.vmem %s297_s30, 32 }
  0x50   :  { %v182_v15 = vmul.f32 0.5, %v95_v11  ;;  %v97_v17 = vpack.c.bf16 %v96_v14, %v95_v11  ;;  %v183_v18 = vmul.f32 0.5, %v96_v14  ;;  %175 = vst.msk [vmem:[#allocation14] sm:$0x1] %vm174_vm3, %v528_v0  ;;  %176 = vst.msk [vmem:[#allocation16] sm:$0x1] %vm174_vm3, %v528_v0 }
  0x51   :  { %v242_v20 = vmul.f32 0.5, %v240_v16  ;;  %vm102_vm4 = vcmask 130048  }
  0x52   :  { %v184_v19 = vmul.f32 %v182_v15, %v95_v11  ;;  %v112_v21 = vsel %vm107_vm1, %v97_v17, 0  ;;  %v185_v22 = vmul.f32 %v183_v18, %v96_v14  ;;  %103 = vst.msk [vmem:[#allocation2] sm:$0xff] %vm102_vm4, %v528_v0 }
  0x53   :  { %328 = vmatpush3.bf16.xpose.msra.mxu0 %v112_v21  ;;  %v243_v27 = vmul.f32 %v242_v20, %v240_v16 }
  0x54   :  { %v186_v24 = vsub.f32 -0.9189385, %v184_v19  ;;  %v187_v28 = vsub.f32 -0.9189385, %v185_v22  ;;  %v167_v22 = vlaneseq }
  0x55   :  { %v353_v29 = vpop.eup %352  ;;  %v244_v31 = vsub.f32 -0.9189385, %v243_v27 }
  0x56   :  { %v188_v30 = vsel %vm107_vm1, %v186_v24, 0.0  ;;  %v355_v33 = vpop.eup %354  ;;  %v189_v34 = vsel %vm107_vm1, %v187_v28, 0.0  ;;  %v206_v36 = vmul.f32 0.6931472, %v353_v29  ;;  %v162_v24 = vld [vmem:[%s735_s7] sm:$0x1] }
  0x57   :  { %v190_v38 = vadd.f32 %v189_v34, %v188_v30  ;;  %v208_v39 = vmul.f32 0.6931472, %v355_v33  ;;  %v246_v41 = vsel %vm245_vm2, %v244_v31, 0.0  ;;  %v357_v42 = vpop.eup %356  ;;  %v181_v19 = vld [vmem:[#allocation14] sm:$0x1]  ;;  %v163_v28 = vmul.f32 %v162_v24, %v161_v23  ;;  %s446_s7 = scalar_lea.vmem %s297_s30, 16 }
  0x58   :  { %v209_v43 = vsub.f32 -0.9189385, %v206_v36  ;;  %247 = vadd.xlane.f32.xlu1 %v246_v41  ;;  %v262_v45 = vmul.f32 0.6931472, %v357_v42  ;;  %v204_v25 = vld [vmem:[#allocation16] sm:$0x1]  ;;  %p447_p4 = scmp.ne.s32.totalorder %s297_s30, %s446_s7  ;;  %p452_p6 = scmp.lt.s32.totalorder %s450_s5, %s446_s7 }
  0x59   :  { %191 = vadd.xlane.f32.xlu0 %v190_v38  ;;  %v210_v44 = vsub.f32 -0.9189385, %v208_v39  ;;  %v104_v26 = vld [vmem:[#allocation2] sm:$0xff]  ;;  %v168_v29 = vshrl.u32 %v167_v22, 7 }
  0x5a   :  { %330 = vmatmul.mubr.msk.bf16.vlgmr.msra.gmra.mrb[0].mxu0 %vm107_vm1, %v106_v35  ;;  %v215_v47 = vsub.f32 %v209_v43, %v213_v37  ;;  %v263_v49 = vsub.f32 -0.9189385, %v262_v45  ;;  %p453_p7 = por %p452_p6, %p451_p5 }
  0x5b   :  { %v216_v48 = vsub.f32 %v210_v44, %v214_v40  ;;  %v164_v40 = vadd.f32 %v163_v28, %v160_v32  ;;  %v169_v41 = vsub.s32 0, %v168_v29 }
  0x5c   :  { %v217_v50 = vsel %vm107_vm1, %v215_v47, 0.0  ;;  %v266_v52 = vsub.f32 %v263_v49, %v265_v46  ;;  %p454_p8 = pnand %p453_p7, %p447_p4 }
  0x5d   :  { %v218_v51 = vsel %vm107_vm1, %v216_v48, 0.0 }
  0x5e   :  { %v219_v53 = vadd.f32 %v218_v51, %v217_v50  ;;  %v267_v54 = vsel %vm245_vm2, %v266_v52, 0.0 }
  0x5f   :  { %268 = vadd.xlane.f32.xlu1 %v267_v54 }
  0x60   :  { %220 = vadd.xlane.f32.xlu0 %v219_v53 }
  0xe5   :  { %v248_v55 = vpop.xlane.xlu1 %247 }
  0xe6   :  { %v192_v56 = vpop.xlane.xlu0 %191  ;;  %v249_v57 = vrot.slane %v248_v55, 4 }
  0xe7   :  { %v193_v58 = vrot.slane %v192_v56, 4 }
  0xe8   :  { %v250_v59 = vadd.f32 %v249_v57, %v248_v55 }
  0xe9   :  { %v194_v60 = vadd.f32 %v193_v58, %v192_v56 }
  0xea   :  { %v251_v62 = vrot.slane %v250_v59, 2 }
  0xeb   :  { %v195_v61 = vrot.slane %v194_v60, 2 }
  0xec   :  { %v269_v1 = vpop.xlane.xlu1 %268  ;;  %v252_v6 = vadd.f32 %v251_v62, %v250_v59 }
  0xed   :  { %v221_v63 = vpop.xlane.xlu0 %220  ;;  %v196_v2 = vadd.f32 %v195_v61, %v194_v60  ;;  %v270_v4 = vrot.slane %v269_v1, 4 }
  0xee   :  { %v222_v3 = vrot.slane %v221_v63, 4  ;;  %v253_v11 = vrot.slane %v252_v6, 1 }
  0xef   :  { %v197_v5 = vrot.slane %v196_v2, 1  ;;  %v271_v8 = vadd.f32 %v270_v4, %v269_v1 }
  0xf0   :  { %v223_v7 = vadd.f32 %v222_v3, %v221_v63  ;;  %v254_v16 = vadd.f32 %v253_v11, %v252_v6 }
  0xf1   :  { %v198_v9 = vadd.f32 %v197_v5, %v196_v2  ;;  %v272_v0 = vrot.slane %v271_v8, 2 }
  0xf2   :  { %v224_v10 = vrot.slane %v223_v7, 2 }
  0xf3   :  { %333 = vpush %v198_v9  ;;  %v273_v13 = vadd.f32 %v272_v0, %v271_v8 }
  0xf4   :  { %v225_v12 = vadd.f32 %v224_v10, %v223_v7 }
  0xf5   :  { %v274_v15 = vrot.slane %v273_v13, 1 }
  0xf6   :  { %v226_v14 = vrot.slane %v225_v12, 1 }
  0xf7   :  { %v275_v18 = vadd.f32 %v274_v15, %v273_v13 }
  0xf8   :  { %v227_v17 = vadd.f32 %v226_v14, %v225_v12 }
  0xfa   :  { %335 = vpush %v227_v17 }
  0xfb   :  { %337 = vpush %v254_v16 }
  0xfc   :  { %339 = vpush %v275_v18 }
 0x124   :  { %s334_s21 = spop %333 }
 0x125   :  { %v200_v20 = vstv %s334_s21 }
 0x126   :  { %v201_v21 = vadd.f32 %v200_v20, %v181_v19 }
 0x128   :  { %203 = vst.msk [vmem:[#allocation14] sm:$0x1] %vm174_vm3, %v201_v21 }
 0x12b   :  { %s336_s1 = spop %335 }
 0x12c   :  { %v229_v27 = vstv %s336_s1  ;;  %s338_s26 = spop %337 }
 0x12d   :  { %v230_v30 = vadd.f32 %v229_v27, %v204_v25  ;;  %v148_v31 = vpop.f32.mrb[0].mxu0  ;;  %v256_v36 = vstv %s338_s26  ;;  %s340_s6 = spop %339 }
 0x12e   :  { %v154_v33 = vadd.f32 %v148_v31, %v104_v26  ;;  %v331_v34 = vpop.f32.mrb[1].mxu0 }
 0x12f   :  { %231 = vst.msk [vmem:[#allocation16] sm:$0x1] %vm174_vm3, %v230_v30  ;;  %v241_v35 = vld [vmem:[#allocation14] sm:$0x1]  ;;  %v151_v37 = vpop.f32.mrb[2].mxu0 }
 0x130   :  { %v257_v38 = vadd.f32 %v256_v36, %v241_v35  ;;  %156 = vst.msk [vmem:[#allocation2] sm:$0xff] %vm102_vm4, %v154_v33  ;;  %v332_v39 = vpop.f32.mrb[3].mxu0 }
 0x132   :  { %259 = vst.msk [vmem:[#allocation14] sm:$0x1] %vm174_vm3, %v257_v38 }
 0x133   :  { %457 = shalt.err (!%p454_p8)
}
 0x134   :  { %s458_s16 = scalar_lea.hbm %s737_s9, 16 }
 0x135   :  { %p459_p9 = scmp.ne.s32.totalorder %s737_s9, %s458_s16  ;;  %p462_p10 = scmp.lt.u32.totalorder %s458_s16, %s737_s9 }
 0x137   :  { %p464_p11 = pnand %p462_p10, %p459_p9 }
 0x139   :  { %467 = shalt.err (!%p464_p11)
}
 0x13a   :  { %299 = dma.vmem_to_hbm [thread:$0]  %s297_s30, 16, %s737_s9, [#allocation15]   ;;  %v170_v42 = vrot.slane %v164_v40, %v169_v41  ;;  %v260_v43 = vld [vmem:[#allocation16] sm:$0x1]  ;;  %v277_v44 = vstv %s340_s6  ;;  %v165_v46 = vld [vmem:[#allocation2] sm:$0xff] }
 0x13b   :  { %s531_s22 = smov [#allocation16]   ;;  %s532_s18 = smov [#allocation13]   ;;  %v278_v45 = vadd.f32 %v277_v44, %v260_v43 }
 0x13c   :  { %s306_s23 = sshll.u32 %s531_s22, 4  ;;  %s286_s19 = sshll.u32 %s532_s18, 4  ;;  %v172_v47 = vadd.f32 %v170_v42, %v165_v46  ;;  %s307_s23 = int_to_ptr.vmem [resolvable:$true] %s306_s23  ;;  %s695_s19 = int_to_ptr.vmem [resolvable:$true] %s286_s19 }
 0x13d   :  { %279 = vst.msk [vmem:[#allocation16] sm:$0x1] %vm174_vm3, %v278_v45  ;;  %s468_s20 = scalar_lea.vmem %s307_s23, 16  ;;  %s472_s9 = scalar_lea.vmem %s307_s23, 32 }
 0x13e   :  { %173 = vst.msk [vmem:[#allocation13] sm:$0xff] %vm102_vm4, %v172_v47  ;;  %p469_p12 = scmp.ne.s32.totalorder %s307_s23, %s468_s20  ;;  %p473_p13 = scmp.lt.s32.totalorder %s307_s23, %s307_s23 }
 0x13f   :  { %p474_p0 = scmp.lt.s32.totalorder %s472_s9, %s468_s20 }
 0x141   :  { %p475_p1 = por %p474_p0, %p473_p13 }
 0x143   :  { %p476_p2 = pnand %p475_p1, %p469_p12 }
 0x145   :  { %479 = shalt.err (!%p476_p2)
}
 0x146   :  { %s480_s25 = scalar_lea.hbm %s738_s10, 16 }
 0x147   :  { %p481_p3 = scmp.ne.s32.totalorder %s738_s10, %s480_s25  ;;  %p484_p4 = scmp.lt.u32.totalorder %s480_s25, %s738_s10 }
 0x149   :  { %p486_p5 = pnand %p484_p4, %p481_p3 }
 0x14b   :  { %489 = shalt.err (!%p486_p5)
}
 0x14c   :  { %309 = dma.vmem_to_hbm [thread:$0]  %s307_s23, 16, %s738_s10, [#allocation15]  }
 0x14d   :  { %s490_s11 = scalar_lea.vmem %s695_s19, 128  ;;  %p495_p7 = scmp.lt.s32.totalorder %s695_s19, %s695_s19 }
 0x14e   :  { %p491_p6 = scmp.ne.s32.totalorder %s695_s19, %s490_s11  ;;  %p496_p8 = scmp.lt.s32.totalorder %s490_s11, %s490_s11 }
 0x150   :  { %p497_p9 = por %p496_p8, %p495_p7 }
 0x152   :  { %p498_p10 = pnand %p497_p9, %p491_p6 }
 0x154   :  { %501 = shalt.err (!%p498_p10)
}
 0x155   :  { %s502_s7 = scalar_lea.hbm %s736_s8, 128 }
 0x156   :  { %p503_p11 = scmp.ne.s32.totalorder %s736_s8, %s502_s7  ;;  %p506_p12 = scmp.lt.u32.totalorder %s502_s7, %s736_s8 }
 0x158   :  { %p508_p13 = pnand %p506_p12, %p503_p11 }
 0x15a   :  { %511 = shalt.err (!%p508_p13)
}
 0x15b   :  { %289 = dma.vmem_to_hbm [thread:$0]  %s695_s19, 128, %s736_s8, [#allocation7]  }
 0x15c   :  { %518 = dma.done.wait [#allocation7], 128  }
 0x15d   :  { %519 = vsyncadd [#allocation7], 4294967168 }
 0x15e   :  { %520 = dma.done.wait [#allocation15], 32  }
 0x15f   :  { %521 = vsyncadd [#allocation15], 4294967264 }
 0x160   :  { %319 = vsyncpa [#allocation6], 1 }
 0x161   :  { %320 = vsyncpa [#allocation9], 1 }
 0x162   :  { %321 = vsyncpa [#allocation12], 1 }
 0x163   :  { %322 = vsyncpa [#allocation7], 1 }
 0x164   :  { %323 = vsyncpa [#allocation15], 1 }

</bundles_post_ra>
